<compile_context>
chip_gen: v7x
topology: tpu7x:2x2x1
jax: 0.10.0
libtpu: 0.0.40
codegen_flags: <defaults>
</compile_context>

<pallas_src>
import jax
import jax.numpy as jnp
from jax import lax
from jax.experimental import pallas as pl
from jax.experimental.pallas import tpu as pltpu


def _round_up(x, m):
    return ((x + m - 1) // m) * m


def _masked_ce_sum(g, labels2, w2, num_classes):
    """sum_i w2[i] * (logsumexp(g[i, :C]) - g[i, labels2[i]]).

    g: (R, Cp) f32 (Cp >= num_classes; pad columns may hold garbage),
    labels2: (R, 1) int32, w2: (R, 1) f32.
    """
    col = lax.broadcasted_iota(jnp.int32, g.shape, 1)
    if g.shape[1] != num_classes:                      # mask lane padding
        g = jnp.where(col < num_classes, g, jnp.float32(-1e30))
    m = jnp.max(g, axis=1, keepdims=True)
    lse = m + jnp.log(jnp.sum(jnp.exp(g - m), axis=1, keepdims=True))
    lab = jnp.sum(jnp.where(col == labels2, g, 0.0), axis=1, keepdims=True)
    return jnp.sum((lse - lab) * w2)


def _make_onehot_kernel(n_pts, n_cls, hw):
    """Small-map path: per-batch maps in VMEM, gather via one-hot MXU matmul."""

    def kernel(labels_ref, w_ref, linr_ref, lino_ref,
               refmap_ref, othmap_ref, out_ref):
        ref_map = refmap_ref[0]                                  # (C, HW)
        oth_map = othmap_ref[0]
        hcol = lax.broadcasted_iota(jnp.int32, (n_pts, hw), 1)
        oh_r = (hcol == linr_ref[0]).astype(ref_map.dtype)       # (N, HW)
        oh_o = (hcol == lino_ref[0]).astype(oth_map.dtype)
        g_r = jnp.einsum("nh,ch->nc", oh_r, ref_map,
                         preferred_element_type=jnp.float32)     # (N, C)
        g_o = jnp.einsum("nh,ch->nc", oh_o, oth_map,
                         preferred_element_type=jnp.float32)
        g = jnp.concatenate([g_r, g_o], axis=0)                  # (2N, C)
        loss = _masked_ce_sum(g, labels_ref[0], w_ref[0], n_cls)
        out_ref[...] = jnp.full(out_ref.shape, loss, dtype=jnp.float32)

    return kernel


def _make_gather_kernel(n_pts, n_cls, c_pad):
    """Large-map path: manual HBM row-gather DMAs, cross-batch double-buffered."""
    two_n = 2 * n_pts

    def kernel(linr_ref, lino_ref,             # SMEM scalar prefetch (B*N,)
               labels_ref, w_ref,              # VMEM blocks (1, 2N, 1)
               ref_hbm, oth_hbm,               # pl.ANY (B, HW, C) channels-last
               out_ref,                        # VMEM block (1, 1, 128)
               gbuf, sems):                    # VMEM (2, 2N, Cpad), DMA sems (2,)
        b = pl.program_id(0)
        n_b = pl.num_programs(0)

        def issue(bb, slot):
            base = bb * n_pts

            def issue_one(nn):
                lr = linr_ref[base + nn]
                lo = lino_ref[base + nn]
                pltpu.make_async_copy(
                    ref_hbm.at[bb, pl.ds(lr, 1), :],
                    gbuf.at[slot, pl.ds(nn, 1), pl.ds(0, n_cls)],
                    sems.at[slot]).start()
                pltpu.make_async_copy(
                    oth_hbm.at[bb, pl.ds(lo, 1), :],
                    gbuf.at[slot, pl.ds(n_pts + nn, 1), pl.ds(0, n_cls)],
                    sems.at[slot]).start()

            if n_pts <= 64:                    # small N: static unroll
                for nn in range(n_pts):
                    issue_one(nn)
            else:                              # large N: chunked issue loop
                def body(nn, carry):
                    issue_one(nn)
                    return carry
                lax.fori_loop(0, n_pts, body, 0, unroll=8)

        slot = b % 2

        @pl.when(b == 0)                       # prime the pipeline
        def _():
            issue(0, 0)

        @pl.when(b + 1 < n_b)                  # cross-batch prefetch
        def _():
            issue(b + 1, (b + 1) % 2)

        # DMA-independent reads while the gathers are in flight.
        labels2 = labels_ref[0]                # (2N, 1)
        w2 = w_ref[0]                          # (2N, 1)

        # ONE aggregate wait per batch: all 2N equal-size copies signal
        # sems[slot]; a dummy descriptor covering the whole (2N, C) window
        # waits for the summed byte count.
        pltpu.make_async_copy(
            ref_hbm.at[b, pl.ds(0, two_n), :],
            gbuf.at[slot, pl.ds(0, two_n), pl.ds(0, n_cls)],
            sems.at[slot]).wait()

        g = gbuf[slot].astype(jnp.float32)     # (2N, Cpad)
        loss = _masked_ce_sum(g, labels2, w2, n_cls)
        out_ref[...] = jnp.full(out_ref.shape, loss, dtype=jnp.float32)

    return kernel


# Per-map VMEM block budget for the onehot path (double-buffered by the
# BlockSpec pipeline; must stay well under v5e's 16 MiB scoped default and
# v7x's 64 MiB physical VMEM) and a cap on the (N, HW) one-hot size.
_ONEHOT_MAP_BYTES = 3 << 20
_ONEHOT_HW_LIMIT = 1 << 14


def cluster_correspondence_loss(inputs_ref, inputs_other, inputs_feat_ref,
                                inds_ref, inds_other, input_size,
                                cluster_info=None, cluster_labels=None,
                                force_path=None):
    """JAX/Pallas version of ClusterCorrespondenceLoss.forward."""
    # TODO(synk): the cluster_info path (host-side preprocess_features PCA +
    # scipy cdist argmin producing labels) has no Pallas equivalent; labels
    # must be provided.
    if cluster_labels is None:
        raise NotImplementedError("cluster_labels must be provided")

    B, C, H, W = inputs_ref.shape
    HW = H * W
    N = inds_ref.shape[-1]
    # The original module indexes the flat map with stride H (size(2)), not W.
    # We reproduce that quirk exactly; it is only meaningful when H == W.
    assert H == W, "stride-H linear indexing (PyTorch quirk) requires H == W"

    if list(input_size) != [H, W]:
        sx = float(W) / float(input_size[1])
        sy = float(H) / float(input_size[0])
    else:
        sx = sy = 1.0

    def prep(inds):                            # (B, 2, N) coords -> lin, valid
        x = inds[:, 0, :].astype(jnp.float32) * sx
        y = inds[:, 1, :].astype(jnp.float32) * sy
        xi = (x + 0.5).astype(jnp.int32)       # trunc toward 0 == torch .long()
        yi = (y + 0.5).astype(jnp.int32)
        lin = H * yi + xi                      # stride-H quirk
        valid = (xi < W) & (xi >= 0) & (yi < H) & (yi >= 0)
        return jnp.clip(lin, 0, HW - 1).astype(jnp.int32), valid

    lin_r, valid_r = prep(inds_ref)            # (B, N) each
    lin_o, valid_o = prep(inds_other)
    valid = valid_r & valid_o                  # joint mask, as in PyTorch

    labels_i = cluster_labels.reshape(B, N).astype(jnp.int32)
    use = (valid & (labels_i != 255)).astype(jnp.float32)          # (B, N)
    cnt = jnp.maximum(jnp.sum(use, axis=1, keepdims=True), 1.0)    # (B, 1)
    w = use / cnt                                                  # (B, N)
    # Duplicate once for the merged (ref rows | other rows) slab.
    labels2 = jnp.concatenate([labels_i, labels_i], axis=1)[..., None]  # (B,2N,1)
    w2 = jnp.concatenate([w, w], axis=1)[..., None]                     # (B,2N,1)

    itemsize = jnp.dtype(inputs_ref.dtype).itemsize
    small_map = (C * HW * itemsize <= _ONEHOT_MAP_BYTES) and (HW <= _ONEHOT_HW_LIMIT)
    path = force_path if force_path is not None else ("onehot" if small_map else "gather")

    if path == "onehot":
        # Maps stay channels-first: no full-map transpose, no manual DMA.
        ref_flat = inputs_ref.reshape(B, C, HW)
        oth_flat = inputs_other.reshape(B, C, HW)
        out = pl.pallas_call(
            _make_onehot_kernel(N, C, HW),
            out_shape=jax.ShapeDtypeStruct((B, 1, 128), jnp.float32),
            grid_spec=pltpu.PrefetchScalarGridSpec(
                num_scalar_prefetch=0,
                grid=(B,),
                in_specs=[
                    pl.BlockSpec((1, 2 * N, 1), lambda b: (b, 0, 0)),   # labels
                    pl.BlockSpec((1, 2 * N, 1), lambda b: (b, 0, 0)),   # weights
                    pl.BlockSpec((1, N, 1), lambda b: (b, 0, 0)),       # lin_r
                    pl.BlockSpec((1, N, 1), lambda b: (b, 0, 0)),       # lin_o
                    pl.BlockSpec((1, C, HW), lambda b: (b, 0, 0)),      # ref map
                    pl.BlockSpec((1, C, HW), lambda b: (b, 0, 0)),      # other map
                ],
                out_specs=pl.BlockSpec((1, 1, 128), lambda b: (b, 0, 0)),
            ),
            compiler_params=pltpu.CompilerParams(
                dimension_semantics=("parallel",)),      # feeds both v7x TCs
        )(labels2, w2,
          lin_r[..., None], lin_o[..., None],
          ref_flat, oth_flat)
    else:
        # Large-map path: logits stay in HBM; only 2*B*N rows are gathered.
        # TODO(synk): in the truly large-map regime the upstream op should
        # emit channels-last logits directly so this transpose (full-map HBM
        # read+write) disappears; the kernel itself touches only 2*B*N*C elems.
        assert 2 * N <= HW, "aggregate-wait sizing assumes 2N <= HW"
        c_pad = _round_up(C, 128)
        ref_rows = jnp.swapaxes(inputs_ref.reshape(B, C, HW), 1, 2)     # (B,HW,C)
        oth_rows = jnp.swapaxes(inputs_other.reshape(B, C, HW), 1, 2)
        out = pl.pallas_call(
            _make_gather_kernel(N, C, c_pad),
            out_shape=jax.ShapeDtypeStruct((B, 1, 128), jnp.float32),
            grid_spec=pltpu.PrefetchScalarGridSpec(
                num_scalar_prefetch=2,                   # lin_r, lin_o -> SMEM
                grid=(B,),
                in_specs=[
                    pl.BlockSpec((1, 2 * N, 1), lambda b, lr, lo: (b, 0, 0)),
                    pl.BlockSpec((1, 2 * N, 1), lambda b, lr, lo: (b, 0, 0)),
                    pl.BlockSpec(memory_space=pl.ANY),   # ref logits (HBM)
                    pl.BlockSpec(memory_space=pl.ANY),   # other logits (HBM)
                ],
                out_specs=pl.BlockSpec((1, 1, 128), lambda b, lr, lo: (b, 0, 0)),
                scratch_shapes=[
                    pltpu.VMEM((2, 2 * N, c_pad), ref_rows.dtype),
                    pltpu.SemaphoreType.DMA((2,)),
                ],
            ),
            # Cross-batch double buffering needs sequential grid execution, so
            # the batch axis is "arbitrary" here (trades v7x megacore sharding
            # for hidden gather latency on every step).
            compiler_params=pltpu.CompilerParams(
                dimension_semantics=("arbitrary",)),
        )(lin_r.reshape(-1), lin_o.reshape(-1),
          labels2, w2, ref_rows, oth_rows)

    loss = jnp.sum(out[:, 0, 0])
    return loss, cluster_labels


def _reference_loss(inputs_ref, inputs_other, inds_ref, inds_other,
                    cluster_labels, input_size):
    """Pure-JAX reference mirroring the PyTorch forward."""
    B, C, H, W = inputs_ref.shape
    if list(input_size) != [H, W]:
        sx, sy = W / input_size[1], H / input_size[0]
    else:
        sx = sy = 1.0
    ref_flat = inputs_ref.reshape(B, C, H * W)
    other_flat = inputs_other.reshape(B, C, H * W)
    total = jnp.float32(0.0)
    for b in range(B):
        xr = (inds_ref[b, 0] * sx + 0.5).astype(jnp.int32)
        yr = (inds_ref[b, 1] * sy + 0.5).astype(jnp.int32)
        xo = (inds_other[b, 0] * sx + 0.5).astype(jnp.int32)
        yo = (inds_other[b, 1] * sy + 0.5).astype(jnp.int32)
        lin_r = H * yr + xr
        lin_o = H * yo + xo
        valid = ((xr < W) & (xr >= 0) & (yr < H) & (yr >= 0) &
                 (xo < W) & (xo >= 0) & (yo < H) & (yo >= 0))
        lab = cluster_labels[b]
        use = valid & (lab != 255)

        def ce(flat, lin):
            g = flat[:, jnp.clip(lin, 0, H * W - 1)]               # (C, N)
            logp = jax.nn.log_softmax(g, axis=0)
            nll = -jnp.take_along_axis(
                logp, jnp.clip(lab, 0, C - 1)[None, :], axis=0)[0]
            return jnp.sum(jnp.where(use, nll, 0.0)) / jnp.maximum(jnp.sum(use), 1)

        total = total + ce(ref_flat[b], lin_r) + ce(other_flat[b], lin_o)
    return total


if __name__ == "__main__":
    B, C, F, H, W, N = 2, 8, 16, 16, 16, 8
    input_size = [32, 32]   # original image resolution the coords refer to

    key = jax.random.PRNGKey(0)
    k1, k2, k3, k4, k5, k6 = jax.random.split(key, 6)
    inputs_ref = jax.random.normal(k1, (B, C, H, W), jnp.float32)
    inputs_other = jax.random.normal(k2, (B, C, H, W), jnp.float32)
    inputs_feat_ref = jax.random.normal(k3, (B, F, H, W), jnp.float32)  # unused
    # Coordinates in [0, 40): some scale past the 16x16 map -> invalid points.
    inds_ref = jax.random.uniform(k4, (B, 2, N), jnp.float32, 0.0, 40.0)
    inds_other = jax.random.uniform(k5, (B, 2, N), jnp.float32, 0.0, 40.0)
    cluster_labels = jax.random.randint(k6, (B, N), 0, C, jnp.int32)
    cluster_labels = cluster_labels.at[0, 0].set(255)   # exercise ignore_index

    ref = _reference_loss(inputs_ref, inputs_other, inds_ref, inds_other,
                          cluster_labels, input_size)

    # Default (small-map) path: VMEM map blocks + one-hot MXU gather.
    loss, _ = cluster_correspondence_loss(
        inputs_ref, inputs_other, inputs_feat_ref, inds_ref, inds_other,
        input_size, cluster_info=None, cluster_labels=cluster_labels)
    loss = jax.block_until_ready(loss)
    assert abs(float(loss) - float(ref)) < 1e-3, (float(loss), float(ref))

    # Large-map path (manual HBM row-gather, double-buffered) forced at the
    # same small shapes to validate it end to end.
    loss_g, _ = cluster_correspondence_loss(
        inputs_ref, inputs_other, inputs_feat_ref, inds_ref, inds_other,
        input_size, cluster_info=None, cluster_labels=cluster_labels,
        force_path="gather")
    loss_g = jax.block_until_ready(loss_g)
    assert abs(float(loss_g) - float(ref)) < 1e-3, (float(loss_g), float(ref))

    print("KERNEL_OK")
</pallas_src>

<mosaic_0001>
module attributes {stable_mosaic.version = 11 : i64} {
  func.func @kernel(%arg0: i32, %arg1: memref<1x16x1xi32, #tpu.memory_space<vmem>>, %arg2: memref<1x16x1xf32, #tpu.memory_space<vmem>>, %arg3: memref<1x8x1xi32, #tpu.memory_space<vmem>>, %arg4: memref<1x8x1xi32, #tpu.memory_space<vmem>>, %arg5: memref<1x8x256xf32, #tpu.memory_space<vmem>>, %arg6: memref<1x8x256xf32, #tpu.memory_space<vmem>>, %arg7: memref<1x1x128xf32, #tpu.memory_space<vmem>>) attributes {dimension_semantics = [#tpu.dimension_semantics<parallel>], iteration_bounds = array<i64: 2>, scalar_prefetch = 0 : i64, scratch_operands = 0 : i64, tpu.core_type = #tpu.core_type<tc>, window_params = [{transform_indices = @transform_0, window_bounds = array<i64: 1, 16, 1>}, {transform_indices = @transform_1, window_bounds = array<i64: 1, 16, 1>}, {transform_indices = @transform_2, window_bounds = array<i64: 1, 8, 1>}, {transform_indices = @transform_3, window_bounds = array<i64: 1, 8, 1>}, {transform_indices = @transform_4, window_bounds = array<i64: 1, 8, 256>}, {transform_indices = @transform_5, window_bounds = array<i64: 1, 8, 256>}, {transform_indices = @transform_6, window_bounds = array<i64: 1, 1, 128>}]} {
    %c0 = arith.constant 0 : index
    %c0_0 = arith.constant 0 : index
    %c0_1 = arith.constant 0 : index
    %0 = vector.load %arg5[%c0, %c0_0, %c0_1] : memref<1x8x256xf32, #tpu.memory_space<vmem>>, vector<1x8x256xf32>
    %1 = vector.shape_cast %0 : vector<1x8x256xf32> to vector<8x256xf32>
    %c0_2 = arith.constant 0 : index
    %c0_3 = arith.constant 0 : index
    %c0_4 = arith.constant 0 : index
    %2 = vector.load %arg6[%c0_2, %c0_3, %c0_4] : memref<1x8x256xf32, #tpu.memory_space<vmem>>, vector<1x8x256xf32>
    %3 = vector.shape_cast %2 : vector<1x8x256xf32> to vector<8x256xf32>
    %4 = tpu.iota {dimensions = array<i32: 1>} : vector<8x256xi32>
    %c0_5 = arith.constant 0 : index
    %c0_6 = arith.constant 0 : index
    %c0_7 = arith.constant 0 : index
    %5 = vector.load %arg3[%c0_5, %c0_6, %c0_7] : memref<1x8x1xi32, #tpu.memory_space<vmem>>, vector<1x8x1xi32>
    %6 = vector.shape_cast %5 : vector<1x8x1xi32> to vector<8x1xi32>
    %7 = vector.broadcast %6 : vector<8x1xi32> to vector<8x256xi32>
    %8 = arith.cmpi eq, %4, %7 : vector<8x256xi32>
    %9 = arith.extui %8 : vector<8x256xi1> to vector<8x256xi32>
    %10 = arith.sitofp %9 : vector<8x256xi32> to vector<8x256xf32>
    %c0_8 = arith.constant 0 : index
    %c0_9 = arith.constant 0 : index
    %c0_10 = arith.constant 0 : index
    %11 = vector.load %arg4[%c0_8, %c0_9, %c0_10] : memref<1x8x1xi32, #tpu.memory_space<vmem>>, vector<1x8x1xi32>
    %12 = vector.shape_cast %11 : vector<1x8x1xi32> to vector<8x1xi32>
    %13 = vector.broadcast %12 : vector<8x1xi32> to vector<8x256xi32>
    %14 = arith.cmpi eq, %4, %13 : vector<8x256xi32>
    %15 = arith.extui %14 : vector<8x256xi1> to vector<8x256xi32>
    %16 = arith.sitofp %15 : vector<8x256xi32> to vector<8x256xf32>
    "tpu.trace_start"() <{level = 10 : i32, message = "nh,ch->nc"}> : () -> ()
    %cst = arith.constant dense<0.000000e+00> : vector<8x8xf32>
    %17 = tpu.matmul %10, %1, %cst {dimension_numbers = #tpu.dot_dimension_numbers<[1], [1], [0], [0], [0, 0, 1, 0], [], []>} : vector<8x256xf32>, vector<8x256xf32>, vector<8x8xf32> -> vector<8x8xf32>
    %cst_11 = arith.constant dense<0.000000e+00> : vector<8x8xf32>
    %18 = tpu.matmul %16, %3, %cst_11 {dimension_numbers = #tpu.dot_dimension_numbers<[1], [1], [0], [0], [0, 0, 1, 0], [], []>} : vector<8x256xf32>, vector<8x256xf32>, vector<8x8xf32> -> vector<8x8xf32>
    "tpu.trace_stop"() : () -> ()
    %19 = tpu.concatenate %17, %18 in 0 : vector<8x8xf32>, vector<8x8xf32> -> vector<16x8xf32>
    %c0_12 = arith.constant 0 : index
    %c0_13 = arith.constant 0 : index
    %c0_14 = arith.constant 0 : index
    %20 = vector.load %arg1[%c0_12, %c0_13, %c0_14] : memref<1x16x1xi32, #tpu.memory_space<vmem>>, vector<1x16x1xi32>
    %21 = vector.shape_cast %20 : vector<1x16x1xi32> to vector<16x1xi32>
    %c0_15 = arith.constant 0 : index
    %c0_16 = arith.constant 0 : index
    %c0_17 = arith.constant 0 : index
    %22 = vector.load %arg2[%c0_15, %c0_16, %c0_17] : memref<1x16x1xf32, #tpu.memory_space<vmem>>, vector<1x16x1xf32>
    %23 = vector.shape_cast %22 : vector<1x16x1xf32> to vector<16x1xf32>
    %24 = tpu.iota {dimensions = array<i32: 1>} : vector<16x8xi32>
    %cst_18 = arith.constant dense<0xFF800000> : vector<16xf32>
    %25 = vector.multi_reduction <maximumf>, %19, %cst_18 [1] : vector<16x8xf32> to vector<16xf32>
    %26 = vector.shape_cast %25 : vector<16xf32> to vector<16x1xf32>
    %27 = vector.broadcast %26 : vector<16x1xf32> to vector<16x8xf32>
    %28 = arith.subf %19, %27 : vector<16x8xf32>
    %29 = math.exp %28 : vector<16x8xf32>
    %cst_19 = arith.constant dense<0.000000e+00> : vector<16xf32>
    %30 = vector.multi_reduction <add>, %29, %cst_19 [1] : vector<16x8xf32> to vector<16xf32>
    %31 = vector.shape_cast %30 : vector<16xf32> to vector<16x1xf32>
    %32 = math.log %31 : vector<16x1xf32>
    %33 = arith.addf %26, %32 : vector<16x1xf32>
    %34 = vector.broadcast %21 : vector<16x1xi32> to vector<16x8xi32>
    %35 = arith.cmpi eq, %24, %34 : vector<16x8xi32>
    %cst_20 = arith.constant 0.000000e+00 : f32
    %36 = vector.broadcast %cst_20 : f32 to vector<16x8xf32>
    %37 = arith.select %35, %19, %36 : vector<16x8xi1>, vector<16x8xf32>
    %cst_21 = arith.constant dense<0.000000e+00> : vector<16xf32>
    %38 = vector.multi_reduction <add>, %37, %cst_21 [1] : vector<16x8xf32> to vector<16xf32>
    %39 = vector.shape_cast %38 : vector<16xf32> to vector<16x1xf32>
    %40 = arith.subf %33, %39 : vector<16x1xf32>
    %41 = arith.mulf %40, %23 : vector<16x1xf32>
    %42 = vector.shape_cast %41 : vector<16x1xf32> to vector<1x16x1xf32>
    %cst_22 = arith.constant dense<0.000000e+00> : vector<1xf32>
    %43 = vector.multi_reduction <add>, %42, %cst_22 [1, 2] : vector<1x16x1xf32> to vector<1xf32>
    %44 = vector.shape_cast %43 : vector<1xf32> to vector<1x1x1xf32>
    %45 = vector.extract %44[0, 0, 0] : f32 from vector<1x1x1xf32>
    %46 = vector.broadcast %45 : f32 to vector<1x1x128xf32>
    %c0_23 = arith.constant 0 : index
    %c0_24 = arith.constant 0 : index
    %c0_25 = arith.constant 0 : index
    %47 = vector.load %arg7[%c0_23, %c0_24, %c0_25] : memref<1x1x128xf32, #tpu.memory_space<vmem>>, vector<1x1x128xf32>
    tpu.vector_store %arg7[%c0_23, %c0_24, %c0_25], %46 {strides = array<i32>} : memref<1x1x128xf32, #tpu.memory_space<vmem>>, vector<1x1x128xf32>,
    return
  }
  func.func @transform_0(%arg0: i32) -> (i32, i32, i32) {
    %c0_i32 = arith.constant 0 : i32
    %c0_i32_0 = arith.constant 0 : i32
    %c0_i32_1 = arith.constant 0 : i32
    return %arg0, %c0_i32, %c0_i32_0 : i32, i32, i32
  }
  func.func @transform_1(%arg0: i32) -> (i32, i32, i32) {
    %c0_i32 = arith.constant 0 : i32
    %c0_i32_0 = arith.constant 0 : i32
    %c0_i32_1 = arith.constant 0 : i32
    return %arg0, %c0_i32, %c0_i32_0 : i32, i32, i32
  }
  func.func @transform_2(%arg0: i32) -> (i32, i32, i32) {
    %c0_i32 = arith.constant 0 : i32
    %c0_i32_0 = arith.constant 0 : i32
    %c0_i32_1 = arith.constant 0 : i32
    return %arg0, %c0_i32, %c0_i32_0 : i32, i32, i32
  }
  func.func @transform_3(%arg0: i32) -> (i32, i32, i32) {
    %c0_i32 = arith.constant 0 : i32
    %c0_i32_0 = arith.constant 0 : i32
    %c0_i32_1 = arith.constant 0 : i32
    return %arg0, %c0_i32, %c0_i32_0 : i32, i32, i32
  }
  func.func @transform_4(%arg0: i32) -> (i32, i32, i32) {
    %c0_i32 = arith.constant 0 : i32
    %c0_i32_0 = arith.constant 0 : i32
    %c0_i32_1 = arith.constant 0 : i32
    return %arg0, %c0_i32, %c0_i32_0 : i32, i32, i32
  }
  func.func @transform_5(%arg0: i32) -> (i32, i32, i32) {
    %c0_i32 = arith.constant 0 : i32
    %c0_i32_0 = arith.constant 0 : i32
    %c0_i32_1 = arith.constant 0 : i32
    return %arg0, %c0_i32, %c0_i32_0 : i32, i32, i32
  }
  func.func @transform_6(%arg0: i32) -> (i32, i32, i32) {
    %c0_i32 = arith.constant 0 : i32
    %c0_i32_0 = arith.constant 0 : i32
    %c0_i32_1 = arith.constant 0 : i32
    return %arg0, %c0_i32, %c0_i32_0 : i32, i32, i32
  }
}

</mosaic_0001>

<bundles_post_ra>
// kernel: tpu_custom_call.1
= control target key start
LH: loop header
LB: loop body
LE: loop exit
PB: predicated region body
PF: predicated region fallthrough
CT: control target
= control target key end

     0   :  { %11 = vsyncpa [#allocation3], 0  ;;  %s1017_s0 = inlined_call_operand.vmem [shape: s32[2,16,1], index: 0, kind: input, shape index: {}]   ;;  %s1018_s1 = inlined_call_operand.vmem [shape: f32[2,16,1], index: 1, kind: input, shape index: {}]   ;;  %s1019_s2 = inlined_call_operand.vmem [shape: s32[2,8,1], index: 2, kind: input, shape index: {}]   ;;  %s1020_s3 = inlined_call_operand.vmem [shape: s32[2,8,1], index: 3, kind: input, shape index: {}]   ;;  %s1021_s4 = inlined_call_operand.vmem [shape: f32[2,8,256], index: 4, kind: input, shape index: {}]   ;;  %s1022_s5 = inlined_call_operand.vmem [shape: f32[2,8,256], index: 5, kind: input, shape index: {}]   ;;  %s1023_s6 = inlined_call_operand.hbm [shape: f32[2,1,128], index: 6, kind: output, shape index: {}]  }
   0x1   :  { %13 = vsyncpa [#allocation3 + $0x1], 0  ;;  %s886_s21 = smov 0   ;;  %s888_s22 = smov 0  }
   0x2   :  { %s890_s23 = smov 0   ;;  %s892_s24 = smov 0  }
   0x3 LB: > { %s907_s25 = sadd.s32 4294967295, %s846_s24   ;;  %s702_s26 = sadd.s32 4294967294, %s846_s24   ;;  %s846_s24 = sphi %s892_s24, %s1029_s24   ;;  %s842_s23 = sphi %s890_s23, %s1028_s23   ;;  %s838_s22 = sphi %s888_s22, %s1027_s22   ;;  %s834_s21 = sphi %s886_s21, %s1026_s21  }
   0x4   : > { %s911_s27 = sadd.s32 1, %s846_s24   ;;  %s182_s28 = sadd.s32 1, %s842_s23 }
   0x5   : > { %s179_s29 = ssub.s32 %s846_s24, %s911_s27  ;;  %p192_p0 = scmp.ne.s32.totalorder %s842_s23, %s838_s22 }
   0x6   : > { %p180_p1 = scmp.eq.s32.totalorder %s179_s29, 0  ;;  %p193_p2 = scmp.eq.s32.totalorder %s907_s25, 1 }
   0x7   : > { %p198_p3 = scmp.ne.s32.totalorder %s838_s22, %s834_s21  ;;  %p199_p4 = scmp.eq.s32.totalorder %s702_s26, 1 }
   0x8   : > { %s922_s30 = scalar_select %p180_p1, %s842_s23, %s182_s28  }
   0x9   : > { %p924_p5 = por %p193_p2, %p192_p0  ;;  %p928_p6 = por %p199_p4, %p198_p3 }
   0xa   : > { %p705_p7 = scmp.ge.s32.totalorder %s846_s24, 1  ;;  %p263_p8 = scmp.lt.s32.totalorder %s846_s24, 3 }
   0xc   : > { %p264_p9 = pnand %p705_p7, %p263_p8 }
   0xd   : > { %p315_p10 = scmp.lt.s32.totalorder (!%p264_p9), %s907_s25, 1  ;;  %v848_v0 = vmov (!%p264_p9), 0   ;;  %v347_v8 = vlaneseq (!%p264_p9)  ;;  %v849_v12 = vmov (!%p264_p9), 1.0   ;;  %vm514_vm4 = vcmask (!%p264_p9), 64512   ;;  %s724_s18 = sshll.u32 (!%p264_p9), %s907_s25, 4 }
   0xe   : > { %267 = sbr.rel (%p264_p9) target bundleno = 914 (0x392), region = 44  ;;  %774 = vset.pattern.permute.xlu0 (!%p264_p9), %v848_v0  ;;  %775 = vset.pattern.permute.xlu1 (!%p264_p9), %v848_v0  ;;  %vm559_vm7 = vcmask (!%p264_p9), 7168   ;;  %s977_s28 = scalar_lea.hbm (!%p264_p9), %s1023_s6, %s724_s18 }
   0xf   : > { %v348_v9 = vand.u32 (!%p264_p9), 127, %v347_v8 }
  0x11   : > { %v349_v10 = vadd.s32 (!%p264_p9), 128, %v348_v9 }
  0x15   : > { %s316_s9 = scalar_select %p315_p10, %s907_s25, 1 }
  0x16   : > { %s850_s25 = smov [#allocation2]  }
  0x17   : > { %s710_s10 = sshll.u32 %s316_s9, 3  ;;  %s936_s11 = sshll.u32 %s316_s9, 4 }
  0x18   : > { %s328_s14 = scalar_lea.vmem %s1019_s2, %s710_s10  ;;  %s332_s17 = scalar_lea.vmem %s1020_s3, %s710_s10 }
  0x19   : > { %v350_v1 = vld [vmem:[%s328_s14] sm:$0xff]  ;;  %s337_s20 = scalar_lea.vmem %s1021_s4, %s936_s11  ;;  %s342_s29 = scalar_lea.vmem %s1022_s5, %s936_s11 }
  0x1a   : > { %352 = vperm.xlu0 %774, %v350_v1   ;;  %v344_v2 = vld [vmem:[%s337_s20 + $0x8] sm:$0xff]  ;;  %v343_v3 = vld [vmem:[%s337_s20] sm:$0xff]  ;;  %s956_s13 = scalar_lea.vmem %s1017_s0, %s936_s11  ;;  %s324_s15 = scalar_lea.vmem %s1018_s1, %s936_s11 }
  0x1b   : > { %v360_v4 = vld [vmem:[%s332_s17] sm:$0xff]  ;;  %370 = vmatprep.subr.mxu0 %v344_v2  ;;  %v346_v5 = vld [vmem:[%s342_s29 + $0x8] sm:$0xff]  ;;  %s313_s11 = sand.u32 1, %s838_s22   ;;  %s788_s12 = sshll.u32 %s850_s25, 4  ;;  %s789_s12 = int_to_ptr.vmem [resolvable:$false] %s788_s12 }
  0x1c   : > { %371 = vmatpush1.xpose.msra.mxu0 %v343_v3  ;;  %440 = vmatprep.subr.mxu1 %v346_v5  ;;  %v345_v6 = vld [vmem:[%s342_s29] sm:$0xff]  ;;  %v511_v20 = vld [vmem:[%s956_s13 + $0x8] sm:$0xff]  ;;  %s314_s16 = scalar_lea.vmem [#allocation2], %s313_s11  ;;  %s575_s29 = scalar_lea.sflag [#allocation3], %s313_s11 }
  0x1d   : > { %441 = vmatpush1.xpose.msra.mxu1 %v345_v6  ;;  %v510_v7 = vld [vmem:[%s956_s13] sm:$0xff]  ;;  %v513_v48 = vld [vmem:[%s324_s15 + $0x8] sm:$0xff]  ;;  %s587_s17 = sshll.u32 %s314_s16, 4  ;;  %s790_s13 = scalar_lea.vmem %s789_s12, 32  ;;  %s972_s17 = int_to_ptr.vmem [resolvable:$true] %s587_s17 }
  0x1e   : > { %362 = vperm.xlu0 %774, %v360_v4   ;;  %v512_v46 = vld [vmem:[%s324_s15] sm:$0xff]  ;;  %s784_s9 = scalar_lea.vmem %s972_s17, 16  ;;  %p791_p0 = scmp.lt.s32.totalorder %s972_s17, %s789_s12 }
  0x1f   : > { %p785_p11 = scmp.ne.s32.totalorder %s972_s17, %s784_s9  ;;  %p792_p1 = scmp.lt.s32.totalorder %s790_s13, %s784_s9 }
  0x21   : > { %p786_p12 = pnand %p785_p11, %p924_p5  ;;  %p793_p2 = por %p792_p1, %p791_p0 }
  0x22   : > { %540 = vperm.xlu0 %774, %v510_v7  }
  0x23   : > { %p787_p13 = pneg %p786_p12 }
  0x25   : > { %p794_p3 = pnand %p793_p2, %p787_p13 }
  0x99   : > { %v353_v11 = vpop.permute.xlu0 %352 }
  0x9a   : > { %vm354_vm0 = vcmp.eq.s32.totalorder %v348_v9, %v353_v11  ;;  %vm355_vm1 = vcmp.eq.s32.totalorder %v349_v10, %v353_v11 }
  0x9b   : > { %720 = vmatprep.mubr.msk.f32.mxu0 %vm355_vm1, %v849_v12 }
  0x9c   : > { %721 = vmatmul.mubr.msk.f32.vlgmr.msra.gmra.mrb[0].mxu0 %vm354_vm0, %v849_v12 }
  0x9d   : > { %v363_v13 = vpop.permute.xlu0 %362 }
  0x9e   : > { %vm364_vm2 = vcmp.eq.s32.totalorder %v348_v9, %v363_v13  ;;  %vm365_vm3 = vcmp.eq.s32.totalorder %v349_v10, %v363_v13 }
  0x9f   : > { %722 = vmatprep.mubr.msk.f32.mxu1 %vm365_vm3, %v849_v12 }
  0xa0   : > { %723 = vmatmul.mubr.msk.f32.vlgmr.msra.gmra.mrb[0].mxu1 %vm364_vm2, %v849_v12 }
  0xa1   : > { %v541_v27 = vpop.permute.xlu0 %540 }
  0xa2   : > { %vm545_vm5 = vcmp.eq.s32.totalorder %v348_v9, %v541_v27 }
 0x16f   : > { %v436_v14 = vpop.f32.mrb[0].mxu0 }
 0x170   : > { %v438_v15 = vpop.f32.mrb[1].mxu0  ;;  %v515_v16 = vsel %vm514_vm4, %v436_v14, -inf  ;;  %v547_v31 = vsel %vm545_vm5, %v436_v14, 0.0 }
 0x171   : > { %516 = vmax.xlane.f32.xlu1 %v515_v16  ;;  %v549_v34 = vsel %vm514_vm4, %v547_v31, 0.0 }
 0x173   : > { %v506_v17 = vpop.f32.mrb[0].mxu1 }
 0x174   : > { %v508_v18 = vpop.f32.mrb[1].mxu1  ;;  %v518_v19 = vsel %vm514_vm4, %v506_v17, -inf }
 0x175   : > { %519 = vmax.xlane.f32.xlu1 %v518_v19 }
 0x186   : > { %543 = vperm.xlu1 %775, %v511_v20  }
 0x1fe   : > { %v517_v21 = vpop.xlane.xlu1 %516 }
 0x1ff   : > { %v521_v22 = vsub.f32 %v436_v14, %v517_v21 }
 0x201   : > { %v523_v23 = vmul.f32 1.442695, %v521_v22 }
 0x202   : > { %v520_v24 = vpop.xlane.xlu1 %519 }
 0x203   : > { %776 = vpow2.f32 %v523_v23  ;;  %v522_v25 = vsub.f32 %v506_v17, %v520_v24 }
 0x205   : > { %v525_v26 = vmul.f32 1.442695, %v522_v25 }
 0x206   : > { %v544_v29 = vpop.permute.xlu1 %543 }
 0x207   : > { %778 = vpow2.f32 %v525_v26  ;;  %vm546_vm6 = vcmp.eq.s32.totalorder %v348_v9, %v544_v29 }
 0x208   : > { %v548_v35 = vsel %vm546_vm6, %v506_v17, 0.0 }
 0x209   : > { %v552_v36 = vsel %vm514_vm4, %v548_v35, 0.0 }
 0x20d   : > { %v777_v28 = vpop.eup %776 }
 0x20e   : > { %v527_v30 = vsel %vm514_vm4, %v777_v28, 0.0 }
 0x20f   : > { %528 = vadd.xlane.f32.xlu0 %v527_v30 }
 0x211   : > { %v779_v32 = vpop.eup %778 }
 0x212   : > { %v530_v33 = vsel %vm514_vm4, %v779_v32, 0.0 }
 0x213   : > { %531 = vadd.xlane.f32.xlu1 %v530_v33  ;;  %550 = vadd.xlane.f32.xlu0 %v549_v34 }
 0x217   : > { %553 = vadd.xlane.f32.xlu0 %v552_v36 }
 0x29c   : > { %v529_v37 = vpop.xlane.xlu0 %528 }
 0x29d   : > { %780 = vlog2.f32 %v529_v37 }
 0x2a0   : > { %v532_v38 = vpop.xlane.xlu1 %531  ;;  %v551_v41 = vpop.xlane.xlu0 %550 }
 0x2a1   : > { %782 = vlog2.f32 %v532_v38 }
 0x2a4   : > { %v554_v49 = vpop.xlane.xlu0 %553 }
 0x2a7   : > { %v781_v39 = vpop.eup %780 }
 0x2a8   : > { %v534_v40 = vmul.f32 0.6931472, %v781_v39 }
 0x2aa   : > { %v537_v42 = vadd.f32 %v534_v40, %v517_v21 }
 0x2ab   : > { %v783_v43 = vpop.eup %782 }
 0x2ac   : > { %v536_v44 = vmul.f32 0.6931472, %v783_v43  ;;  %v555_v45 = vsub.f32 %v537_v42, %v551_v41 }
 0x2ae   : > { %v538_v47 = vadd.f32 %v536_v44, %v520_v24  ;;  %v557_v50 = vmul.f32 %v555_v45, %v512_v46 }
 0x2b0   : > { %v556_v51 = vsub.f32 %v538_v47, %v554_v49  ;;  %v560_v53 = vsel %vm559_vm7, %v557_v50, 0.0 }
 0x2b2   : > { %v558_v52 = vmul.f32 %v556_v51, %v513_v48 }
 0x2b4   : > { %v561_v54 = vsel %vm559_vm7, %v558_v52, 0.0 }
 0x2b5   : > { %v562_v55 = vadd.f32 %v561_v54, %v560_v53 }
 0x2b7   : > { %563 = vadd.xlane.f32.xlu0 %v562_v55 }
 0x344   : > { %v564_v56 = vpop.xlane.xlu0 %563 }
 0x345   : > { %v565_v57 = vrot.slane %v564_v56, 4 }
 0x347   : > { %v566_v58 = vadd.f32 %v565_v57, %v564_v56 }
 0x349   : > { %v567_v59 = vrot.slane %v566_v58, 2 }
 0x34b   : > { %v568_v60 = vadd.f32 %v567_v59, %v566_v58 }
 0x34d   : > { %v569_v61 = vrot.slane %v568_v60, 1 }
 0x34f   : > { %v570_v62 = vadd.f32 %v569_v61, %v568_v60 }
 0x351   : > { %731 = vpush %v570_v62 }
 0x382   : > { %s732_s19 = spop %731 }
 0x383   : > { %v572_v63 = vstv %s732_s19 }
 0x384   : > { %573 = vst [vmem:[%s314_s16] sm:$0x1] %v572_v63 }
 0x385   : > { %797 = shalt.err (!%p794_p3)
}
 0x386   : > { %s798_s10 = scalar_lea.hbm %s977_s28, 16  ;;  %s802_s11 = scalar_lea.hbm %s1023_s6, 32 }
 0x387   : > { %p799_p4 = scmp.ne.s32.totalorder %s977_s28, %s798_s10  ;;  %p803_p9 = scmp.lt.u32.totalorder %s977_s28, %s1023_s6 }
 0x388   : > { %p804_p10 = scmp.lt.u32.totalorder %s802_s11, %s798_s10  ;;  %p806_p12 = scmp.lt.u32.totalorder %s798_s10, %s977_s28 }
 0x389   : > { %p800_p7 = pnand %p799_p4, %p924_p5 }
 0x38a   : > { %p805_p11 = por %p804_p10, %p803_p9 }
 0x38b   : > { %p801_p8 = pneg %p800_p7 }
 0x38c   : > { %p807_p13 = por %p806_p12, %p805_p11 }
 0x38e   : > { %p808_p0 = pnand %p807_p13, %p801_p8 }
 0x390   : > { %811 = shalt.err (!%p808_p0)
}
 0x391   : > { %733 = dma.vmem_to_hbm [thread:$0]  (%p924_p5), %s972_s17, 16, %s977_s28, %s575_s29  }
 0x392 PF: > { %p739_p1 = scmp.ge.s32.totalorder %s846_s24, 2  ;;  %s599_s19 = sand.u32 1, %s834_s21  }
 0x393   : > { %s600_s20 = scalar_lea.sflag [#allocation3], %s599_s19 }
 0x394   : > { %p736_p2 = pnand %p739_p1, %p928_p6 }
 0x396   : > { %829 = dma.done.wait (!%p736_p2), %s600_s20, 16  }
 0x397   : > { %831 = vsyncadd (!%p736_p2), %s600_s20, 4294967280  ;;  %p16_p3 = scmp.ge.s32.totalorder %s911_s27, 4   ;;  %s1026_s21 = smov %s838_s22 }
 0x398   : > { %s1027_s22 = smov %s842_s23  ;;  %s1028_s23 = smov %s922_s30 }
 0x399   : > { %s1029_s24 = smov %s911_s27  ;;  %18 = sbr.rel (!%p16_p3) target bundleno = 3 (0x3), region = 94 }
 0x3a0   :  { %604 = vsyncpa [#allocation3], 1 }
 0x3a1   :  { %606 = vsyncpa [#allocation3 + $0x1], 1 }

</bundles_post_ra>
